<compile_context>
chip_gen: v7x
topology: tpu7x:2x2x1
jax: 0.10.0
libtpu: 0.0.40
codegen_flags: <defaults>
</compile_context>

<pallas_src>
import jax
import jax.numpy as jnp
from jax import lax
from jax.experimental import pallas as pl
from jax.experimental.pallas import tpu as pltpu


# ---------------------------------------------------------------------------
# VMEM budgeting / tile selection
# ---------------------------------------------------------------------------
_VMEM_LIMIT_CACHE = None


def _vmem_limit_bytes():
    """Per-generation VMEM limit with headroom (v7x: 64 MiB, v5e/v6e: 128 MiB)."""
    global _VMEM_LIMIT_CACHE
    if _VMEM_LIMIT_CACHE is None:
        cap = 64 * 1024 * 1024  # conservative default (v7x per-TC physical)
        try:
            info = pltpu.get_tpu_info()
            c = getattr(info, "vmem_capacity_bytes", None)
            if c:
                cap = int(c)
        except Exception:
            pass
        _VMEM_LIMIT_CACHE = min(cap * 3 // 4, 100 * 1024 * 1024)
    return _VMEM_LIMIT_CACHE


def _round_up(v, m):
    return (v + m - 1) // m * m


def _pick_tile(m, target, min_steps=4):
    """Largest lane-aligned column tile <= target, keeping >= min_steps grid steps."""
    if m <= 128:
        return m
    t = max(128, min(target, m))
    per_step = max(128, (pl.cdiv(m, min_steps) // 128) * 128)
    t = min(t, per_step)
    return (t // 128) * 128


def _col_tile(m, bytes_per_col, cap=8192, floor=512):
    budget = _vmem_limit_bytes() // 3        # double-buffered blocks + headroom
    target = max(floor, min(budget // max(bytes_per_col, 1), cap))
    return _pick_tile(m, target)


# ---------------------------------------------------------------------------
# Pallas kernels
# ---------------------------------------------------------------------------
def _mask_kernel(xin_ref, w_ref, b_ref, wp_ref, bp_ref, o_ref):
    # theta_g + phi_g in one matmul:  (inter, 10C) @ (10C, tile)
    s = jnp.dot(w_ref[...], xin_ref[...],
                preferred_element_type=jnp.float32) + b_ref[...]
    s = jnp.maximum(s, 0.0)                                     # ReLU
    # `path` 1x1x1 conv to 1 channel: VPU multiply + sublane reduction
    a = jnp.sum(s * wp_ref[...], axis=0, keepdims=True) + bp_ref[...]
    o_ref[...] = jax.nn.sigmoid(a).astype(o_ref.dtype)          # lane-dense (1, tile)


def _apply_kernel(m_ref, x_ref, wy_ref, by_ref, o_ref):
    x = x_ref[...]                                              # (C, tile)
    att = m_ref[...] * x                                        # bcast over sublanes
    y = jnp.dot(wy_ref[...], att,
                preferred_element_type=jnp.float32) + by_ref[...]
    o_ref[...] = (y + x).astype(o_ref.dtype)                    # Wy(att) + x residual


# ---------------------------------------------------------------------------
# pallas_call wrappers
# ---------------------------------------------------------------------------
def _mask_pallas(xin, w_cat, b_cat, wp_col, bp):
    k10c, m2 = xin.shape
    inter = w_cat.shape[0]
    bytes_per_col = 4 * 2 * (_round_up(k10c, 8) + 8)            # in + out, double-buffered
    tile = _col_tile(m2, bytes_per_col)
    grid = (pl.cdiv(m2, tile),)
    ce = pl.CostEstimate(
        flops=2 * m2 * k10c * inter + 4 * m2 * inter,
        transcendentals=m2,
        bytes_accessed=4 * (m2 * k10c + m2 + k10c * inter + 2 * inter + 1))
    return pl.pallas_call(
        _mask_kernel,
        out_shape=jax.ShapeDtypeStruct((1, m2), jnp.float32),
        grid=grid,
        in_specs=[
            pl.BlockSpec((k10c, tile), lambda i: (0, i)),
            pl.BlockSpec((inter, k10c), lambda i: (0, 0)),
            pl.BlockSpec((inter, 1), lambda i: (0, 0)),
            pl.BlockSpec((inter, 1), lambda i: (0, 0)),
            pl.BlockSpec((1, 1), lambda i: (0, 0)),
        ],
        out_specs=pl.BlockSpec((1, tile), lambda i: (0, i)),
        compiler_params=pltpu.CompilerParams(
            dimension_semantics=("parallel",),
            vmem_limit_bytes=_vmem_limit_bytes()),
        cost_estimate=ce,
    )(xin, w_cat, b_cat, wp_col, bp)


def _apply_pallas(m_row, x_cm, wy2, by_col):
    c, m = x_cm.shape
    cp = _round_up(c, 8)
    bytes_per_col = 4 * 2 * (cp + 8 + cp)                       # x + mask + out, dbl-buffered
    tile = _col_tile(m, bytes_per_col)
    grid = (pl.cdiv(m, tile),)
    ce = pl.CostEstimate(
        flops=2 * m * c * c + 3 * m * c,
        transcendentals=0,
        bytes_accessed=4 * (2 * m * c + m + c * c + c))
    return pl.pallas_call(
        _apply_kernel,
        out_shape=jax.ShapeDtypeStruct((c, m), jnp.float32),
        grid=grid,
        in_specs=[
            pl.BlockSpec((1, tile), lambda i: (0, i)),
            pl.BlockSpec((c, tile), lambda i: (0, i)),
            pl.BlockSpec((c, c), lambda i: (0, 0)),
            pl.BlockSpec((c, 1), lambda i: (0, 0)),
        ],
        out_specs=pl.BlockSpec((c, tile), lambda i: (0, i)),
        compiler_params=pltpu.CompilerParams(
            dimension_semantics=("parallel",),
            vmem_limit_bytes=_vmem_limit_bytes()),
        cost_estimate=ce,
    )(m_row, x_cm, wy2, by_col)


# ---------------------------------------------------------------------------
# Trilinear upsample (matches F.interpolate(mode='trilinear', align_corners=False))
# x2 case: fixed 0.75/0.25 stencil, no dynamic gathers. General sizes fall back.
# ---------------------------------------------------------------------------
def _upsample2x_axis(a, axis):
    n = a.shape[axis]
    sl = lambda s, e: lax.slice_in_dim(a, s, e, axis=axis)
    a_prev = jnp.concatenate([sl(0, 1), sl(0, n - 1)], axis=axis)   # a[j-1], edge-clamped
    a_next = jnp.concatenate([sl(1, n), sl(n - 1, n)], axis=axis)   # a[j+1], edge-clamped
    even = 0.75 * a + 0.25 * a_prev
    odd = 0.75 * a + 0.25 * a_next
    out = jnp.stack([even, odd], axis=axis + 1)
    shp = list(a.shape)
    shp[axis] = 2 * n
    return out.reshape(shp)


def _linear_axis_weights(in_size, out_size):
    scale = in_size / out_size
    o = jnp.arange(out_size, dtype=jnp.float32)
    src = jnp.maximum((o + 0.5) * scale - 0.5, 0.0)
    i0 = jnp.minimum(jnp.floor(src).astype(jnp.int32), in_size - 1)
    i1 = jnp.minimum(i0 + 1, in_size - 1)
    t = src - i0.astype(jnp.float32)
    return i0, i1, t


def _interp_axis(a, axis, out_size):
    i0, i1, t = _linear_axis_weights(a.shape[axis], out_size)
    a0 = jnp.take(a, i0, axis=axis)
    a1 = jnp.take(a, i1, axis=axis)
    shp = [1] * a.ndim
    shp[axis] = out_size
    t = t.reshape(shp)
    return a0 * (1.0 - t) + a1 * t


def _trilinear_upsample_general(mask, out_dhw):
    # TODO(synk): general-size trilinear stays as gather-based JAX glue.
    for ax, sz in zip((2, 3, 4), out_dhw):
        mask = _interp_axis(mask, ax, sz)
    return mask


def trilinear_upsample(mask, out_dhw):
    # mask: (N, 1, d, h, w) -> (N, 1, D, H, W)
    in_dhw = mask.shape[2:]
    if all(o == 2 * i for o, i in zip(out_dhw, in_dhw)):
        a = mask
        for ax in (2, 3, 4):
            a = _upsample2x_axis(a, ax)
        return a
    return _trilinear_upsample_general(mask, out_dhw)


# ---------------------------------------------------------------------------
# Parameters (PyTorch-shaped, deterministic init) + forward
# ---------------------------------------------------------------------------
def init_params(key, in_channels):
    inter = max(in_channels // 2, 1)
    ks = jax.random.split(key, 8)
    s = 0.1
    return dict(
        wx=s * jax.random.normal(ks[0], (inter, in_channels, 2, 2, 2), jnp.float32),
        bx=s * jax.random.normal(ks[1], (inter,), jnp.float32),
        wg=s * jax.random.normal(ks[2], (inter, 2 * in_channels, 1, 1, 1), jnp.float32),
        bg=s * jax.random.normal(ks[3], (inter,), jnp.float32),
        wp=s * jax.random.normal(ks[4], (1, inter, 1, 1, 1), jnp.float32),
        bp=s * jax.random.normal(ks[5], (1,), jnp.float32),
        wy=s * jax.random.normal(ks[6], (in_channels, in_channels, 1, 1, 1), jnp.float32),
        by=s * jax.random.normal(ks[7], (in_channels,), jnp.float32),
    )


def attention_gate_forward(x, xg, g, params, in_shape):
    # x, xg: (N, C, D, H, W);  g: (N, 2C, D2, H2, W2) with D2 = D//2 etc.
    N, C, D, H, W = x.shape
    D2, H2, W2 = g.shape[2:]
    inter = params['wx'].shape[0]
    M2 = N * D2 * H2 * W2
    M = N * D * H * W

    # --- mask branch: channels-first slab [space_to_depth(xg) ; g] -> (10C, M2) ---
    xg_e = xg[:, :, :2 * D2, :2 * H2, :2 * W2]           # 'valid' conv drops odd tail
    xgp = xg_e.reshape(N, C, D2, 2, H2, 2, W2, 2)
    xgp = xgp.transpose(1, 3, 5, 7, 0, 2, 4, 6).reshape(C * 8, M2)   # rows (c,kd,kh,kw)
    gf = g.transpose(1, 0, 2, 3, 4).reshape(2 * C, M2)               # cheap N<->C swap
    xin = jnp.concatenate([xgp, gf], axis=0)                         # (10C, M2)

    w_cat = jnp.concatenate([params['wx'].reshape(inter, C * 8),
                             params['wg'].reshape(inter, 2 * C)], axis=1)  # (inter, 10C)
    b_cat = (params['bx'] + params['bg']).reshape(inter, 1)
    wp_col = params['wp'].reshape(inter, 1)
    bp = params['bp'].reshape(1, 1)

    mask_row = _mask_pallas(xin, w_cat, b_cat, wp_col, bp)           # (1, M2)
    mask = mask_row.reshape(N, 1, D2, H2, W2)

    # --- x2 trilinear upsample (constant-weight stencil, no gathers) ---
    up = trilinear_upsample(mask, in_shape)                          # (N,1,D,H,W)
    m_row = up.reshape(1, M)                                         # cols ordered (n,d,h,w)

    # --- apply branch: mask*x, Wy, residual fused in one kernel ---
    x_cm = x.transpose(1, 0, 2, 3, 4).reshape(C, M)                  # cheap N<->C swap
    wy2 = params['wy'].reshape(C, C)
    by_col = params['by'].reshape(C, 1)
    out_cm = _apply_pallas(m_row, x_cm, wy2, by_col)                 # (C, M)
    return out_cm.reshape(C, N, D, H, W).transpose(1, 0, 2, 3, 4)


# ---------------------------------------------------------------------------
# Pure-JAX reference (independent path, gather-based upsample) for sanity check
# ---------------------------------------------------------------------------
def _reference_forward(x, xg, g, params, in_shape):
    N, C, D, H, W = x.shape
    D2, H2, W2 = g.shape[2:]
    inter = params['wx'].shape[0]
    xgp = xg[:, :, :2 * D2, :2 * H2, :2 * W2].reshape(N, C, D2, 2, H2, 2, W2, 2)
    xgp = xgp.transpose(0, 2, 4, 6, 1, 3, 5, 7).reshape(-1, C * 8)
    theta = xgp @ params['wx'].reshape(inter, C * 8).T + params['bx']
    gf = g.transpose(0, 2, 3, 4, 1).reshape(-1, 2 * C)
    phi = gf @ params['wg'].reshape(inter, 2 * C).T + params['bg']
    a = jnp.maximum(theta + phi, 0.0) @ params['wp'].reshape(1, inter).T + params['bp']
    mask = jax.nn.sigmoid(a).reshape(N, D2, H2, W2, 1).transpose(0, 4, 1, 2, 3)
    up = _trilinear_upsample_general(mask, in_shape)
    xf = x.transpose(0, 2, 3, 4, 1).reshape(-1, C)
    mf = up.transpose(0, 2, 3, 4, 1).reshape(-1, 1)
    out = (mf * xf) @ params['wy'].reshape(C, C).T + params['by'] + xf
    return out.reshape(N, D, H, W, C).transpose(0, 4, 1, 2, 3)


if __name__ == "__main__":
    key = jax.random.PRNGKey(0)
    N, C = 2, 4
    D = H = W = 8
    in_shape = (D, H, W)

    kx, kxg, kg, kp = jax.random.split(key, 4)
    x = jax.random.normal(kx, (N, C, D, H, W), jnp.float32)
    xg = jax.random.normal(kxg, (N, C, D, H, W), jnp.float32)
    g = jax.random.normal(kg, (N, 2 * C, D // 2, H // 2, W // 2), jnp.float32)
    params = init_params(kp, C)

    fwd = jax.jit(attention_gate_forward, static_argnums=(4,))
    out = jax.block_until_ready(fwd(x, xg, g, params, in_shape))
    assert out.shape == x.shape, out.shape

    ref = jax.block_until_ready(_reference_forward(x, xg, g, params, in_shape))
    err = float(jnp.max(jnp.abs(out - ref)))
    assert jnp.allclose(out, ref, atol=1e-4, rtol=1e-4), err

    print("KERNEL_OK")
</pallas_src>

<mosaic_0001>
module attributes {stable_mosaic.version = 11 : i64} {
  func.func @_mask_kernel(%arg0: i32, %arg1: memref<40x128xf32, #tpu.memory_space<vmem>>, %arg2: memref<2x40xf32, #tpu.memory_space<vmem>>, %arg3: memref<2x1xf32, #tpu.memory_space<vmem>>, %arg4: memref<2x1xf32, #tpu.memory_space<vmem>>, %arg5: memref<1x1xf32, #tpu.memory_space<vmem>>, %arg6: memref<1x128xf32, #tpu.memory_space<vmem>>) attributes {dimension_semantics = [#tpu.dimension_semantics<parallel>], iteration_bounds = array<i64: 1>, scalar_prefetch = 0 : i64, scratch_operands = 0 : i64, tpu.core_type = #tpu.core_type<tc>, window_params = [{transform_indices = @transform_0, window_bounds = array<i64: 40, 128>}, {pipeline_mode = #tpu.pipeline_mode<synchronous>, transform_indices = @transform_1, window_bounds = array<i64: 2, 40>}, {pipeline_mode = #tpu.pipeline_mode<synchronous>, transform_indices = @transform_2, window_bounds = array<i64: 2, 1>}, {pipeline_mode = #tpu.pipeline_mode<synchronous>, transform_indices = @transform_3, window_bounds = array<i64: 2, 1>}, {pipeline_mode = #tpu.pipeline_mode<synchronous>, transform_indices = @transform_4, window_bounds = array<i64: 1, 1>}, {transform_indices = @transform_5, window_bounds = array<i64: 1, 128>}]} {
    %c0 = arith.constant 0 : index
    %c0_0 = arith.constant 0 : index
    %0 = vector.load %arg2[%c0, %c0_0] : memref<2x40xf32, #tpu.memory_space<vmem>>, vector<2x40xf32>
    %c0_1 = arith.constant 0 : index
    %c0_2 = arith.constant 0 : index
    %1 = vector.load %arg1[%c0_1, %c0_2] : memref<40x128xf32, #tpu.memory_space<vmem>>, vector<40x128xf32>
    %cst = arith.constant dense<0.000000e+00> : vector<2x128xf32>
    %2 = tpu.matmul %0, %1, %cst {dimension_numbers = #tpu.dot_dimension_numbers<[1], [0], [0], [1], [0, 0, 1, 1], [], []>} : vector<2x40xf32>, vector<40x128xf32>, vector<2x128xf32> -> vector<2x128xf32>
    %c0_3 = arith.constant 0 : index
    %c0_4 = arith.constant 0 : index
    %3 = vector.load %arg3[%c0_3, %c0_4] : memref<2x1xf32, #tpu.memory_space<vmem>>, vector<2x1xf32>
    %4 = vector.broadcast %3 : vector<2x1xf32> to vector<2x128xf32>
    %5 = arith.addf %2, %4 : vector<2x128xf32>
    %cst_5 = arith.constant 0.000000e+00 : f32
    %6 = vector.broadcast %cst_5 : f32 to vector<2x128xf32>
    %7 = arith.maximumf %5, %6 : vector<2x128xf32>
    %c0_6 = arith.constant 0 : index
    %c0_7 = arith.constant 0 : index
    %8 = vector.load %arg4[%c0_6, %c0_7] : memref<2x1xf32, #tpu.memory_space<vmem>>, vector<2x1xf32>
    %9 = vector.broadcast %8 : vector<2x1xf32> to vector<2x128xf32>
    %10 = arith.mulf %7, %9 : vector<2x128xf32>
    %cst_8 = arith.constant dense<0.000000e+00> : vector<128xf32>
    %11 = vector.multi_reduction <add>, %10, %cst_8 [0] : vector<2x128xf32> to vector<128xf32>
    %12 = vector.shape_cast %11 : vector<128xf32> to vector<1x128xf32>
    %c0_9 = arith.constant 0 : index
    %c0_10 = arith.constant 0 : index
    %13 = vector.load %arg5[%c0_9, %c0_10] : memref<1x1xf32, #tpu.memory_space<vmem>>, vector<1x1xf32>
    %14 = vector.broadcast %13 : vector<1x1xf32> to vector<1x128xf32>
    %15 = arith.addf %12, %14 : vector<1x128xf32>
    %16 = arith.negf %15 : vector<1x128xf32>
    %17 = math.exp %16 : vector<1x128xf32>
    %cst_11 = arith.constant 1.000000e+00 : f32
    %18 = vector.broadcast %cst_11 : f32 to vector<1x128xf32>
    %19 = arith.addf %18, %17 : vector<1x128xf32>
    %20 = arith.divf %18, %19 : vector<1x128xf32>
    %c0_12 = arith.constant 0 : index
    %c0_13 = arith.constant 0 : index
    %21 = vector.load %arg6[%c0_12, %c0_13] : memref<1x128xf32, #tpu.memory_space<vmem>>, vector<1x128xf32>
    tpu.vector_store %arg6[%c0_12, %c0_13], %20 {strides = array<i32>} : memref<1x128xf32, #tpu.memory_space<vmem>>, vector<1x128xf32>,
    return
  }
  func.func @transform_0(%arg0: i32) -> (i32, i32) {
    %c0_i32 = arith.constant 0 : i32
    %c0_i32_0 = arith.constant 0 : i32
    return %c0_i32, %arg0 : i32, i32
  }
  func.func @transform_1(%arg0: i32) -> (i32, i32) {
    %c0_i32 = arith.constant 0 : i32
    %c0_i32_0 = arith.constant 0 : i32
    %c0_i32_1 = arith.constant 0 : i32
    return %c0_i32, %c0_i32_0 : i32, i32
  }
  func.func @transform_2(%arg0: i32) -> (i32, i32) {
    %c0_i32 = arith.constant 0 : i32
    %c0_i32_0 = arith.constant 0 : i32
    %c0_i32_1 = arith.constant 0 : i32
    return %c0_i32, %c0_i32_0 : i32, i32
  }
  func.func @transform_3(%arg0: i32) -> (i32, i32) {
    %c0_i32 = arith.constant 0 : i32
    %c0_i32_0 = arith.constant 0 : i32
    %c0_i32_1 = arith.constant 0 : i32
    return %c0_i32, %c0_i32_0 : i32, i32
  }
  func.func @transform_4(%arg0: i32) -> (i32, i32) {
    %c0_i32 = arith.constant 0 : i32
    %c0_i32_0 = arith.constant 0 : i32
    %c0_i32_1 = arith.constant 0 : i32
    return %c0_i32, %c0_i32_0 : i32, i32
  }
  func.func @transform_5(%arg0: i32) -> (i32, i32) {
    %c0_i32 = arith.constant 0 : i32
    %c0_i32_0 = arith.constant 0 : i32
    return %c0_i32, %arg0 : i32, i32
  }
}

module attributes {stable_mosaic.version = 11 : i64} {
  func.func @_apply_kernel(%arg0: i32, %arg1: memref<1x256xf32, #tpu.memory_space<vmem>>, %arg2: memref<4x256xf32, #tpu.memory_space<vmem>>, %arg3: memref<4x4xf32, #tpu.memory_space<vmem>>, %arg4: memref<4x1xf32, #tpu.memory_space<vmem>>, %arg5: memref<4x256xf32, #tpu.memory_space<vmem>>) attributes {dimension_semantics = [#tpu.dimension_semantics<parallel>], iteration_bounds = array<i64: 4>, scalar_prefetch = 0 : i64, scratch_operands = 0 : i64, tpu.core_type = #tpu.core_type<tc>, window_params = [{transform_indices = @transform_0, window_bounds = array<i64: 1, 256>}, {transform_indices = @transform_1, window_bounds = array<i64: 4, 256>}, {pipeline_mode = #tpu.pipeline_mode<synchronous>, transform_indices = @transform_2, window_bounds = array<i64: 4, 4>}, {pipeline_mode = #tpu.pipeline_mode<synchronous>, transform_indices = @transform_3, window_bounds = array<i64: 4, 1>}, {transform_indices = @transform_4, window_bounds = array<i64: 4, 256>}]} {
    %c0 = arith.constant 0 : index
    %c0_0 = arith.constant 0 : index
    %0 = vector.load %arg2[%c0, %c0_0] : memref<4x256xf32, #tpu.memory_space<vmem>>, vector<4x256xf32>
    %c0_1 = arith.constant 0 : index
    %c0_2 = arith.constant 0 : index
    %1 = vector.load %arg1[%c0_1, %c0_2] : memref<1x256xf32, #tpu.memory_space<vmem>>, vector<1x256xf32>
    %2 = vector.broadcast %1 : vector<1x256xf32> to vector<4x256xf32>
    %3 = arith.mulf %2, %0 : vector<4x256xf32>
    %c0_3 = arith.constant 0 : index
    %c0_4 = arith.constant 0 : index
    %4 = vector.load %arg3[%c0_3, %c0_4] : memref<4x4xf32, #tpu.memory_space<vmem>>, vector<4x4xf32>
    %cst = arith.constant dense<0.000000e+00> : vector<4x256xf32>
    %5 = tpu.matmul %4, %3, %cst {dimension_numbers = #tpu.dot_dimension_numbers<[1], [0], [0], [1], [0, 0, 1, 1], [], []>} : vector<4x4xf32>, vector<4x256xf32>, vector<4x256xf32> -> vector<4x256xf32>
    %c0_5 = arith.constant 0 : index
    %c0_6 = arith.constant 0 : index
    %6 = vector.load %arg4[%c0_5, %c0_6] : memref<4x1xf32, #tpu.memory_space<vmem>>, vector<4x1xf32>
    %7 = vector.broadcast %6 : vector<4x1xf32> to vector<4x256xf32>
    %8 = arith.addf %5, %7 : vector<4x256xf32>
    %9 = arith.addf %8, %0 : vector<4x256xf32>
    %c0_7 = arith.constant 0 : index
    %c0_8 = arith.constant 0 : index
    %10 = vector.load %arg5[%c0_7, %c0_8] : memref<4x256xf32, #tpu.memory_space<vmem>>, vector<4x256xf32>
    tpu.vector_store %arg5[%c0_7, %c0_8], %9 {strides = array<i32>} : memref<4x256xf32, #tpu.memory_space<vmem>>, vector<4x256xf32>,
    return
  }
  func.func @transform_0(%arg0: i32) -> (i32, i32) {
    %c0_i32 = arith.constant 0 : i32
    %c0_i32_0 = arith.constant 0 : i32
    return %c0_i32, %arg0 : i32, i32
  }
  func.func @transform_1(%arg0: i32) -> (i32, i32) {
    %c0_i32 = arith.constant 0 : i32
    %c0_i32_0 = arith.constant 0 : i32
    return %c0_i32, %arg0 : i32, i32
  }
  func.func @transform_2(%arg0: i32) -> (i32, i32) {
    %c0_i32 = arith.constant 0 : i32
    %c0_i32_0 = arith.constant 0 : i32
    %c0_i32_1 = arith.constant 0 : i32
    return %c0_i32, %c0_i32_0 : i32, i32
  }
  func.func @transform_3(%arg0: i32) -> (i32, i32) {
    %c0_i32 = arith.constant 0 : i32
    %c0_i32_0 = arith.constant 0 : i32
    %c0_i32_1 = arith.constant 0 : i32
    return %c0_i32, %c0_i32_0 : i32, i32
  }
  func.func @transform_4(%arg0: i32) -> (i32, i32) {
    %c0_i32 = arith.constant 0 : i32
    %c0_i32_0 = arith.constant 0 : i32
    return %c0_i32, %arg0 : i32, i32
  }
}

</mosaic_0001>

<bundles_post_ra>
// kernel: attention_gate_forward.2
= control target key start
LH: loop header
LB: loop body
LE: loop exit
PB: predicated region body
PF: predicated region fallthrough
CT: control target
= control target key end

     0   :  { %v183_v0 = vmov 0.0|0.0   ;;  %vm184_vm0 = vmmov 0   ;;  %v185_v4 = vmov 0.0   ;;  %v186_v8 = vmov 0   ;;  %s247_s0 = inlined_call_operand.vmem [shape: f32[40,128], index: 0, kind: input, shape index: {}]   ;;  %s248_s2 = inlined_call_operand.vmem [shape: f32[2,1], index: 2, kind: input, shape index: {}]   ;;  %s249_s4 = inlined_call_operand.<no memory space> [shape: f32[1,1], index: 4, kind: input, shape index: {}]   ;;  %s250_s3 = inlined_call_operand.vmem [shape: f32[2,1], index: 3, kind: input, shape index: {}]   ;;  %s251_s1 = inlined_call_operand.vmem [shape: f32[2,40], index: 1, kind: input, shape index: {}]   ;;  %s252_s5 = inlined_call_operand.vmem [shape: f32[1,128], index: 5, kind: output, shape index: {}]  }
   0x1   :  { %167 = vmatprep.subr.bf16.mxu0 %v183_v0  ;;  %v23_v1 = vld [vmem:[%s247_s0] sm:$0xff]  ;;  %v24_v2 = vld [vmem:[%s247_s0 + $0x8] sm:$0xff]  ;;  %v25_v3 = vld [vmem:[%s247_s0 + $0x10] sm:$0xff]  ;;  %164 = vmatprep.mubr.msk.f32.mxu0 %vm184_vm0, %v185_v4  ;;  %v10_v5 = vstv %s249_s4  ;;  %vm34_vm1 = vcmask 326656   ;;  %vm116_vm2 = vcmask 1041408   ;;  %v130_v21 = vlaneseq }
   0x2   :  { %v168_v6 = vpack.c.bf16 %v24_v2, %v23_v1  ;;  %v26_v7 = vld [vmem:[%s247_s0 + $0x18] sm:$0xff]  ;;  %177 = vset.pattern.permute.xlu0 %v186_v8  ;;  %178 = vset.pattern.permute.xlu1 %v186_v8  ;;  %11 = vst [vmem:[#allocation2] sm:$0x1] %v10_v5  ;;  %v28_v9 = vld [vmem:[%s248_s2] sm:$0x3] }
   0x3   :  { %v171_v10 = vpack.c.bf16 %v26_v7, %v25_v3  ;;  %31 = vperm.xlu0 %177, %v28_v9   ;;  %v109_v11 = vld [vmem:[%s250_s3] sm:$0x3]  ;;  %v131_v25 = vshrl.u32 %v130_v21, 7 }
   0x4   :  { %169 = vmatpush3.bf16.msra.mxu0 %v168_v6  ;;  %v27_v12 = vld [vmem:[%s247_s0 + $0x20] sm:$0xff] }
   0x5   :  { %170 = vmatprep.subr.bf16.mxu0 %v183_v0  ;;  %v22_v14 = vld [vmem:[%s251_s1] sm:$0x3]  ;;  %v132_v28 = vsub.s32 0, %v131_v25 }
   0x7   :  { %112 = vperm.xlu0 %177, %v109_v11  }
   0x8   :  { %172 = vmatpush3.bf16.msra.mxu0 %v171_v10 }
   0x9   :  { %162 = vmatprep.subr.mxu0 %v185_v4  ;;  %v124_v13 = vld [vmem:[#allocation2] sm:$0x1] }
   0xa   :  { %127 = vperm.xlu1 %178, %v124_v13  }
   0xc   :  { %163 = vmatpush3.msra.mxu0 %v27_v12 }
   0xd   :  { %165 = vmatmul.mubr.msk.f32.vlgmr.msra.gmra.mrb[0].mxu0 %vm34_vm1, %v22_v14 }
  0x82   :  { %v32_v15 = vpop.permute.xlu0 %31 }
  0x86   :  { %v113_v20 = vpop.permute.xlu0 %112 }
  0x89   :  { %v128_v29 = vpop.permute.xlu1 %127 }
  0x8a   :  { %v133_v32 = vrot.slane %v128_v29, %v132_v28 }
  0xe0   :  { %v104_v16 = vpop.f32.mrb[0].mxu0 }
  0xe1   :  { %v105_v17 = vadd.f32 %v104_v16, %v32_v15  ;;  %v166_v18 = vpop.f32.mrb[1].mxu0 }
  0xe3   :  { %v108_v19 = vmax.f32 %v105_v17, 0.0 }
  0xe5   :  { %v115_v22 = vmul.f32 %v113_v20, %v108_v19 }
  0xe7   :  { %v117_v23 = vsel %vm116_vm2, %v115_v22, 0.0 }
  0xe8   :  { %v118_v24 = vrot.slane %v117_v23, 4 }
  0xea   :  { %v119_v26 = vadd.f32 %v118_v24, %v117_v23 }
  0xec   :  { %v120_v27 = vrot.slane %v119_v26, 2 }
  0xee   :  { %v121_v30 = vadd.f32 %v120_v27, %v119_v26 }
  0xf0   :  { %v122_v31 = vrot.slane %v121_v30, 1 }
  0xf2   :  { %v123_v33 = vadd.f32 %v122_v31, %v121_v30 }
  0xf4   :  { %v134_v34 = vadd.f32 %v133_v32, %v123_v33 }
  0xf6   :  { %v147_v35 = vmul.f32 -1.442695, %v134_v34 }
  0xf8   :  { %179 = vpow2.f32 %v147_v35 }
 0x102   :  { %v180_v36 = vpop.eup %179 }
 0x103   :  { %v138_v37 = vadd.f32 1.0, %v180_v36 }
 0x105   :  { %181 = vrcp.f32 %v138_v37 }
 0x10f   :  { %v182_v38 = vpop.eup %181 }
 0x110   :  { %141 = vst [vmem:[%s252_s5] sm:$0x1] %v182_v38 }

// kernel: attention_gate_forward.3
= control target key start
LH: loop header
LB: loop body
LE: loop exit
PB: predicated region body
PF: predicated region fallthrough
CT: control target
= control target key end

     0   :  { %s461_s15 = smov 0   ;;  %s487_s0 = inlined_call_operand.vmem [shape: f32[1,1024], index: 0, kind: input, shape index: {}]   ;;  %s488_s1 = inlined_call_operand.vmem [shape: f32[4,1024], index: 1, kind: input, shape index: {}]   ;;  %s489_s2 = inlined_call_operand.vmem [shape: f32[4,4], index: 2, kind: input, shape index: {}]   ;;  %s490_s3 = inlined_call_operand.vmem [shape: f32[4,1], index: 3, kind: input, shape index: {}]   ;;  %s491_s4 = inlined_call_operand.vmem [shape: f32[4,1024], index: 4, kind: output, shape index: {}]  }
   0x1 LB: > { %s399_s16 = sadd.s32 4294967295, %s432_s15   ;;  %p403_p0 = scmp.ge.s32.totalorder %s432_s15, 1  ;;  %s432_s15 = sphi %s461_s15, %s14_s15  }
   0x2   : > { %p173_p1 = scmp.lt.s32.totalorder %s432_s15, 5 }
   0x4   : > { %p174_p2 = pnand %p403_p0, %p173_p1 }
   0x5   : > { %s404_s17 = sshll.u32 (!%p174_p2), %s399_s16, 1  ;;  %v223_v0 = vlaneseq (!%p174_p2)  ;;  %v434_v1 = vmov (!%p174_p2), 0.0   ;;  %v239_v2 = vld [vmem:[%s490_s3] sm:$0xf] (!%p174_p2)  ;;  %v435_v4 = vmov (!%p174_p2), 0   ;;  %vm249_vm0 = vcmask (!%p174_p2), 1043456  }
   0x6   : > { %177 = sbr.rel (%p174_p2) target bundleno = 243 (0xf3), region = 36  ;;  %p204_p3 = scmp.lt.s32.totalorder (!%p174_p2), %s404_s17, 7  ;;  %320 = vmatprep.mubr.f32.mxu0 (!%p174_p2), %v434_v1  ;;  %424 = vset.pattern.permute.xlu0 (!%p174_p2), %v435_v4  ;;  %v238_v14 = vld [vmem:[%s489_s2] sm:$0xf] (!%p174_p2)  ;;  %vm245_vm1 = vcmask (!%p174_p2), 31744  }
   0x7   : > { %v224_v3 = vshrl.u32 (!%p174_p2), %v223_v0, 7  ;;  %242 = vperm.xlu0 (!%p174_p2), %424, %v239_v2  }
   0x9   : > { %v225_v5 = vsub.s32 (!%p174_p2), 0, %v224_v3  ;;  %v229_v6 = vsub.s32 (!%p174_p2), 1, %v224_v3 }
   0xd   : > { %s493_s17 = smov (!%p204_p3, %s404_s17), 7 }
   0xe   : > { %s206_s22 = scalar_lea.vmem %s487_s0, %s493_s17  ;;  %s406_s23 = sshll.u32 %s493_s17, 2 }
   0xf   : > { %s212_s26 = scalar_lea.vmem %s488_s1, %s406_s23  ;;  %v221_v7 = vld [vmem:[%s206_s22] sm:$0x3]  ;;  %s218_s5 = scalar_lea.vmem %s491_s4, %s406_s23 }
  0x10   : > { %v220_v8 = vld [vmem:[%s212_s26] sm:$0xff]  ;;  %v226_v9 = vrot.slane %v221_v7, %v225_v5  ;;  %v230_v10 = vrot.slane %v221_v7, %v229_v6 }
  0x11   : > { %v234_v11 = vcombine.high %v220_v8, %v220_v8 }
  0x12   : > { %v236_v12 = vmul.f32 %v226_v9, %v220_v8 }
  0x13   : > { %v237_v13 = vmul.f32 %v234_v11, %v230_v10 }
  0x15   : > { %409 = vmatprep.subr.msk.mxu0 %vm249_vm0, %v237_v13 }
  0x16   : > { %410 = vmatpush1.msk.msra.mxu0 %vm249_vm0, %v236_v12 }
  0x17   : > { %411 = vmatmul.mubr.msk.f32.vlgmr.msra.gmra.mrb[0].mxu0 %vm245_vm1, %v238_v14 }
  0x86   : > { %v243_v15 = vpop.permute.xlu0 %242 }
  0xea   : > { %v322_v16 = vpop.f32.mrb[0].mxu0 }
  0xeb   : > { %v323_v17 = vadd.f32 %v322_v16, %v243_v15  ;;  %v324_v18 = vpop.f32.mrb[1].mxu0 }
  0xec   : > { %v325_v19 = vadd.f32 %v324_v18, %v243_v15 }
  0xed   : > { %v327_v20 = vadd.f32 %v323_v17, %v220_v8 }
  0xee   : > { %v328_v21 = vadd.f32 %v325_v19, %v234_v11 }
  0xf0   : > { %v331_v22 = vcombine.low %v327_v20, %v328_v21 }
  0xf2   : > { %333 = vst [vmem:[%s218_s5] sm:$0xff] %v331_v22 }
  0xf3 PF: > { %s14_s15 = sadd.s32 1, %s432_s15  }
  0xf4   : > { %p11_p4 = scmp.ge.s32.totalorder %s14_s15, 6  }
  0xf6   :  { %13 = sbr.rel (!%p11_p4) target bundleno = 1 (0x1), region = 69 }

</bundles_post_ra>
